<compile_context>
chip_gen: v6e
topology: v6e:2x2x1
jax: 0.10.0
libtpu: 0.0.40
codegen_flags: <defaults>
</compile_context>

<pallas_src>
import functools

import jax
import jax.numpy as jnp
from jax import lax
from jax.experimental import pallas as pl
from jax.experimental.pallas import tpu as pltpu

_VMEM_LIMIT_BYTES = 32 * 1024 * 1024      # well under v7x's 64 MiB physical VMEM
_BLOCK_BUDGET_BYTES = 2 * 1024 * 1024     # per-block target (double-buffered by Pallas)


def _pick_tiles(R, L, elem_bytes=4, block_budget_bytes=_BLOCK_BUDGET_BYTES):
    """Pick (row_tile, lane_tile) for an (R, L) view.

    Lane tile: a multiple of 128 that divides L (so the lane-axis reduction never
    sees a padded tail), or the full L when L is not 128-aligned (allowed: block
    dim equal to the array dim). Row tile: multiple of 8 (or full R); row tails
    are safe because every result is per-row and tail writes are cropped.
    """
    if L % 128 == 0:
        tl = min(L, 4096)
        tl -= tl % 128
        while L % tl:
            tl -= 128
    else:
        tl = L
    max_rows = max(1, block_budget_bytes // (tl * elem_bytes))
    if R <= max_rows:
        tr = R
    else:
        tr = max(8, (max_rows // 8) * 8)
    return tr, tl


# ------------------------------------------------------------------
# Pass 1: per-(n, c)-row centered sum and sum-of-squares.
#   s = x - m0   (m0 = running/source mean for that row's channel)
#   sum_ref  += sum_l s
#   sq_ref   += sum_l s*s
# Grid = (row tiles [parallel], lane tiles [arbitrary/reduction]).
# Outputs are resident (tr, 1) accumulators across the lane axis.
# ------------------------------------------------------------------
def _stats_kernel(x_ref, m0_ref, sum_ref, sq_ref):
    @pl.when(pl.program_id(1) == 0)
    def _():
        sum_ref[...] = jnp.zeros_like(sum_ref)
        sq_ref[...] = jnp.zeros_like(sq_ref)

    s = x_ref[...].astype(jnp.float32) - m0_ref[...]
    sum_ref[...] += jnp.sum(s, axis=1, keepdims=True)
    sq_ref[...] += jnp.sum(s * s, axis=1, keepdims=True)


# ------------------------------------------------------------------
# Pass 2: fused normalize + affine:  y = x * scale + shift
# scale/shift are per-row (per (n, c)) and broadcast across lanes.
# ------------------------------------------------------------------
def _norm_kernel(x_ref, scale_ref, shift_ref, o_ref):
    x = x_ref[...].astype(jnp.float32)
    o_ref[...] = (x * scale_ref[...] + shift_ref[...]).astype(o_ref.dtype)


@functools.partial(jax.jit, static_argnames=("momentum", "eps"))
def momentum_bn_forward(x_nchw, weight, bias, source_mean, source_var,
                        *, momentum=0.1, eps=1e-5):
    """Forward pass of MomentumBN. Returns (y_nchw, blended_mean, blended_var)."""
    N, C, H, W = x_nchw.shape
    R, L = N * C, H * W

    # Pure view of contiguous NCHW memory — no transpose, no extra HBM pass.
    x2 = x_nchw.reshape(R, L)

    tr, tl = _pick_tiles(R, L)
    rg, lg = pl.cdiv(R, tr), pl.cdiv(L, tl)

    src_mean_f32 = source_mean.astype(jnp.float32)
    src_var_f32 = source_var.astype(jnp.float32)

    # Per-row centering value (running mean of that row's channel).
    m0_rows = jnp.broadcast_to(src_mean_f32[None, :], (N, C)).reshape(R, 1)

    # ---- pass 1: per-row centered batch statistics ----
    row_sum, row_sq = pl.pallas_call(
        _stats_kernel,
        out_shape=(jax.ShapeDtypeStruct((R, 1), jnp.float32),
                   jax.ShapeDtypeStruct((R, 1), jnp.float32)),
        grid_spec=pltpu.PrefetchScalarGridSpec(
            num_scalar_prefetch=0,
            grid=(rg, lg),
            in_specs=[pl.BlockSpec((tr, tl), lambda i, j: (i, j)),
                      pl.BlockSpec((tr, 1), lambda i, j: (i, 0))],
            out_specs=(pl.BlockSpec((tr, 1), lambda i, j: (i, 0)),
                       pl.BlockSpec((tr, 1), lambda i, j: (i, 0)))),
        compiler_params=pltpu.CompilerParams(
            dimension_semantics=("parallel", "arbitrary"),
            vmem_limit_bytes=_VMEM_LIMIT_BYTES),
    )(x2, m0_rows)

    # ---- (C,)-sized glue: combine per-(n,c) partials, blend, fold to scale/shift ----
    cnt = jnp.float32(N * H * W)
    ch_sum_s = row_sum.reshape(N, C).sum(axis=0)   # sum of (x - m0) per channel
    ch_sq_s = row_sq.reshape(N, C).sum(axis=0)     # sum of (x - m0)^2 per channel
    d_mean = ch_sum_s / cnt                        # E[x] - m0
    b_mean = src_mean_f32 + d_mean                 # batch mean
    b_var = ch_sq_s / cnt - d_mean * d_mean        # biased variance (exact, well-conditioned)

    mean = (1.0 - momentum) * src_mean_f32 + momentum * b_mean
    var = (1.0 - momentum) * src_var_f32 + momentum * b_var

    scale = weight.astype(jnp.float32) * lax.rsqrt(var + eps)
    shift = bias.astype(jnp.float32) - mean * scale
    scale_rows = jnp.broadcast_to(scale[None, :], (N, C)).reshape(R, 1)
    shift_rows = jnp.broadcast_to(shift[None, :], (N, C)).reshape(R, 1)

    # ---- pass 2: fused normalize + affine (streaming, lane-dense) ----
    y2 = pl.pallas_call(
        _norm_kernel,
        out_shape=jax.ShapeDtypeStruct((R, L), x2.dtype),
        grid_spec=pltpu.PrefetchScalarGridSpec(
            num_scalar_prefetch=0,
            grid=(rg, lg),
            in_specs=[pl.BlockSpec((tr, tl), lambda i, j: (i, j)),
                      pl.BlockSpec((tr, 1), lambda i, j: (i, 0)),
                      pl.BlockSpec((tr, 1), lambda i, j: (i, 0))],
            out_specs=pl.BlockSpec((tr, tl), lambda i, j: (i, j))),
        compiler_params=pltpu.CompilerParams(
            dimension_semantics=("parallel", "parallel"),
            vmem_limit_bytes=_VMEM_LIMIT_BYTES),
    )(x2, scale_rows, shift_rows)

    # Pure view back to NCHW — no transpose.
    y = y2.reshape(N, C, H, W)
    return y, mean, var


def _reference(x, w, b, src_mean, src_var, momentum, eps):
    b_mean = jnp.mean(x, axis=(0, 2, 3))
    b_var = jnp.var(x, axis=(0, 2, 3))
    mean = (1.0 - momentum) * src_mean + momentum * b_mean
    var = (1.0 - momentum) * src_var + momentum * b_var
    mr = mean.reshape(1, -1, 1, 1)
    vr = var.reshape(1, -1, 1, 1)
    y = (x - mr) / jnp.sqrt(vr + eps)
    return y * w.reshape(1, -1, 1, 1) + b.reshape(1, -1, 1, 1), mean, var


if __name__ == "__main__":
    key = jax.random.PRNGKey(0)
    kx, kw, kb, km, kv = jax.random.split(key, 5)

    N, C, H, W = 2, 4, 16, 16
    momentum = 0.1
    eps = 1e-5

    x = jax.random.normal(kx, (N, C, H, W), dtype=jnp.float32) * 2.0 + 0.5
    # Deterministic "checkpoint-like" parameters/buffers (shapes from __init__)
    weight = jax.random.normal(kw, (C,), dtype=jnp.float32) * 0.1 + 1.0
    bias = jax.random.normal(kb, (C,), dtype=jnp.float32) * 0.1
    source_mean = jax.random.normal(km, (C,), dtype=jnp.float32) * 0.2
    source_var = jnp.abs(jax.random.normal(kv, (C,), dtype=jnp.float32)) * 0.3 + 0.8

    y, new_mean, new_var = momentum_bn_forward(
        x, weight, bias, source_mean, source_var, momentum=momentum, eps=eps)
    jax.block_until_ready(y)

    y_ref, mean_ref, var_ref = _reference(
        x, weight, bias, source_mean, source_var, momentum, eps)

    assert jnp.allclose(y, y_ref, atol=1e-4, rtol=1e-4), "output mismatch"
    assert jnp.allclose(new_mean, mean_ref, atol=1e-5), "mean mismatch"
    assert jnp.allclose(new_var, var_ref, atol=1e-4), "var mismatch"

    print("KERNEL_OK")
</pallas_src>

<mosaic_0001>
module attributes {stable_mosaic.version = 11 : i64} {
  func.func @_stats_kernel(%arg0: i32, %arg1: i32, %arg2: memref<8x256xf32, #tpu.memory_space<vmem>>, %arg3: memref<8x1xf32, #tpu.memory_space<vmem>>, %arg4: memref<8x1xf32, #tpu.memory_space<vmem>>, %arg5: memref<8x1xf32, #tpu.memory_space<vmem>>) attributes {dimension_semantics = [#tpu.dimension_semantics<parallel>, #tpu.dimension_semantics<arbitrary>], iteration_bounds = array<i64: 1, 1>, scalar_prefetch = 0 : i64, scratch_operands = 0 : i64, tpu.core_type = #tpu.core_type<tc>, window_params = [{transform_indices = @transform_0, window_bounds = array<i64: 8, 256>}, {transform_indices = @transform_1, window_bounds = array<i64: 8, 1>}, {transform_indices = @transform_2, window_bounds = array<i64: 8, 1>}, {transform_indices = @transform_3, window_bounds = array<i64: 8, 1>}]} {
    %c0_i32 = arith.constant 0 : i32
    %0 = arith.cmpi eq, %arg1, %c0_i32 : i32
    %1 = arith.extui %0 : i1 to i32
    %c0_i32_0 = arith.constant 0 : i32
    %2 = arith.cmpi ne, %1, %c0_i32_0 : i32
    scf.if %2 {
      %cst_13 = arith.constant 0.000000e+00 : f32
      %18 = vector.broadcast %cst_13 : f32 to vector<8x1xf32>
      %c0_14 = arith.constant 0 : index
      %c0_15 = arith.constant 0 : index
      %19 = vector.load %arg4[%c0_14, %c0_15] : memref<8x1xf32, #tpu.memory_space<vmem>>, vector<8x1xf32>
      tpu.vector_store %arg4[%c0_14, %c0_15], %18 {strides = array<i32>} : memref<8x1xf32, #tpu.memory_space<vmem>>, vector<8x1xf32>,
      %cst_16 = arith.constant 0.000000e+00 : f32
      %20 = vector.broadcast %cst_16 : f32 to vector<8x1xf32>
      %c0_17 = arith.constant 0 : index
      %c0_18 = arith.constant 0 : index
      %21 = vector.load %arg5[%c0_17, %c0_18] : memref<8x1xf32, #tpu.memory_space<vmem>>, vector<8x1xf32>
      tpu.vector_store %arg5[%c0_17, %c0_18], %20 {strides = array<i32>} : memref<8x1xf32, #tpu.memory_space<vmem>>, vector<8x1xf32>,
    } else {
    }
    %c0 = arith.constant 0 : index
    %c0_1 = arith.constant 0 : index
    %3 = vector.load %arg2[%c0, %c0_1] : memref<8x256xf32, #tpu.memory_space<vmem>>, vector<8x256xf32>
    %c0_2 = arith.constant 0 : index
    %c0_3 = arith.constant 0 : index
    %4 = vector.load %arg3[%c0_2, %c0_3] : memref<8x1xf32, #tpu.memory_space<vmem>>, vector<8x1xf32>
    %5 = vector.broadcast %4 : vector<8x1xf32> to vector<8x256xf32>
    %6 = arith.subf %3, %5 : vector<8x256xf32>
    %c0_4 = arith.constant 0 : index
    %c0_5 = arith.constant 0 : index
    %7 = vector.load %arg4[%c0_4, %c0_5] : memref<8x1xf32, #tpu.memory_space<vmem>>, vector<8x1xf32>
    %cst = arith.constant dense<0.000000e+00> : vector<8xf32>
    %8 = vector.multi_reduction <add>, %6, %cst [1] : vector<8x256xf32> to vector<8xf32>
    %9 = vector.shape_cast %8 : vector<8xf32> to vector<8x1xf32>
    %10 = arith.addf %7, %9 : vector<8x1xf32>
    %c0_6 = arith.constant 0 : index
    %c0_7 = arith.constant 0 : index
    %11 = vector.load %arg4[%c0_6, %c0_7] : memref<8x1xf32, #tpu.memory_space<vmem>>, vector<8x1xf32>
    tpu.vector_store %arg4[%c0_6, %c0_7], %10 {strides = array<i32>} : memref<8x1xf32, #tpu.memory_space<vmem>>, vector<8x1xf32>,
    %c0_8 = arith.constant 0 : index
    %c0_9 = arith.constant 0 : index
    %12 = vector.load %arg5[%c0_8, %c0_9] : memref<8x1xf32, #tpu.memory_space<vmem>>, vector<8x1xf32>
    %13 = arith.mulf %6, %6 : vector<8x256xf32>
    %cst_10 = arith.constant dense<0.000000e+00> : vector<8xf32>
    %14 = vector.multi_reduction <add>, %13, %cst_10 [1] : vector<8x256xf32> to vector<8xf32>
    %15 = vector.shape_cast %14 : vector<8xf32> to vector<8x1xf32>
    %16 = arith.addf %12, %15 : vector<8x1xf32>
    %c0_11 = arith.constant 0 : index
    %c0_12 = arith.constant 0 : index
    %17 = vector.load %arg5[%c0_11, %c0_12] : memref<8x1xf32, #tpu.memory_space<vmem>>, vector<8x1xf32>
    tpu.vector_store %arg5[%c0_11, %c0_12], %16 {strides = array<i32>} : memref<8x1xf32, #tpu.memory_space<vmem>>, vector<8x1xf32>,
    return
  }
  func.func @transform_0(%arg0: i32, %arg1: i32) -> (i32, i32) {
    %c0_i32 = arith.constant 0 : i32
    return %arg0, %arg1 : i32, i32
  }
  func.func @transform_1(%arg0: i32, %arg1: i32) -> (i32, i32) {
    %c0_i32 = arith.constant 0 : i32
    %c0_i32_0 = arith.constant 0 : i32
    return %arg0, %c0_i32 : i32, i32
  }
  func.func @transform_2(%arg0: i32, %arg1: i32) -> (i32, i32) {
    %c0_i32 = arith.constant 0 : i32
    %c0_i32_0 = arith.constant 0 : i32
    return %arg0, %c0_i32 : i32, i32
  }
  func.func @transform_3(%arg0: i32, %arg1: i32) -> (i32, i32) {
    %c0_i32 = arith.constant 0 : i32
    %c0_i32_0 = arith.constant 0 : i32
    return %arg0, %c0_i32 : i32, i32
  }
}

module attributes {stable_mosaic.version = 11 : i64} {
  func.func @_norm_kernel(%arg0: i32, %arg1: i32, %arg2: memref<8x256xf32, #tpu.memory_space<vmem>>, %arg3: memref<8x1xf32, #tpu.memory_space<vmem>>, %arg4: memref<8x1xf32, #tpu.memory_space<vmem>>, %arg5: memref<8x256xf32, #tpu.memory_space<vmem>>) attributes {dimension_semantics = [#tpu.dimension_semantics<parallel>, #tpu.dimension_semantics<parallel>], iteration_bounds = array<i64: 1, 1>, scalar_prefetch = 0 : i64, scratch_operands = 0 : i64, tpu.core_type = #tpu.core_type<tc>, window_params = [{transform_indices = @transform_0, window_bounds = array<i64: 8, 256>}, {transform_indices = @transform_1, window_bounds = array<i64: 8, 1>}, {transform_indices = @transform_2, window_bounds = array<i64: 8, 1>}, {transform_indices = @transform_3, window_bounds = array<i64: 8, 256>}]} {
    %c0 = arith.constant 0 : index
    %c0_0 = arith.constant 0 : index
    %0 = vector.load %arg2[%c0, %c0_0] : memref<8x256xf32, #tpu.memory_space<vmem>>, vector<8x256xf32>
    %c0_1 = arith.constant 0 : index
    %c0_2 = arith.constant 0 : index
    %1 = vector.load %arg3[%c0_1, %c0_2] : memref<8x1xf32, #tpu.memory_space<vmem>>, vector<8x1xf32>
    %2 = vector.broadcast %1 : vector<8x1xf32> to vector<8x256xf32>
    %3 = arith.mulf %0, %2 : vector<8x256xf32>
    %c0_3 = arith.constant 0 : index
    %c0_4 = arith.constant 0 : index
    %4 = vector.load %arg4[%c0_3, %c0_4] : memref<8x1xf32, #tpu.memory_space<vmem>>, vector<8x1xf32>
    %5 = vector.broadcast %4 : vector<8x1xf32> to vector<8x256xf32>
    %6 = arith.addf %3, %5 : vector<8x256xf32>
    %c0_5 = arith.constant 0 : index
    %c0_6 = arith.constant 0 : index
    %7 = vector.load %arg5[%c0_5, %c0_6] : memref<8x256xf32, #tpu.memory_space<vmem>>, vector<8x256xf32>
    tpu.vector_store %arg5[%c0_5, %c0_6], %6 {strides = array<i32>} : memref<8x256xf32, #tpu.memory_space<vmem>>, vector<8x256xf32>,
    return
  }
  func.func @transform_0(%arg0: i32, %arg1: i32) -> (i32, i32) {
    %c0_i32 = arith.constant 0 : i32
    return %arg0, %arg1 : i32, i32
  }
  func.func @transform_1(%arg0: i32, %arg1: i32) -> (i32, i32) {
    %c0_i32 = arith.constant 0 : i32
    %c0_i32_0 = arith.constant 0 : i32
    return %arg0, %c0_i32 : i32, i32
  }
  func.func @transform_2(%arg0: i32, %arg1: i32) -> (i32, i32) {
    %c0_i32 = arith.constant 0 : i32
    %c0_i32_0 = arith.constant 0 : i32
    return %arg0, %c0_i32 : i32, i32
  }
  func.func @transform_3(%arg0: i32, %arg1: i32) -> (i32, i32) {
    %c0_i32 = arith.constant 0 : i32
    return %arg0, %arg1 : i32, i32
  }
}

</mosaic_0001>

<bundles_post_ra>
// kernel: momentum_bn_forward.2
= control target key start
LH: loop header
LB: loop body
LE: loop exit
PB: predicated region body
PF: predicated region fallthrough
CT: control target
= control target key end

     0   :  { %v56_v0 = vmov 0   ;;  %vm17_vm0 = vcmask 7168   ;;  %v57_v2 = vmov 0.0   ;;  %s109_s1 = inlined_call_operand.vmem [shape: f32[8,1], index: 1, kind: input, shape index: {}]   ;;  %s110_s2 = inlined_call_operand.vmem [shape: f32[8,1], index: 2, kind: output, shape index: {0}]   ;;  %s111_s0 = inlined_call_operand.vmem [shape: f32[8,256], index: 0, kind: input, shape index: {}]   ;;  %s112_s3 = inlined_call_operand.vmem [shape: f32[8,1], index: 3, kind: output, shape index: {1}]  }
   0x1   :  { %55 = vset.pattern.permute.xlu0 %v56_v0  ;;  %v22_v1 = vld [vmem:[%s109_s1] sm:$0xff]  ;;  %18 = vst.msk [vmem:[%s110_s2] sm:$0xff] %vm17_vm0, %v57_v2  ;;  %v21_v4 = vld [vmem:[%s111_s0 + $0x8] sm:$0xff]  ;;  %19 = vst.msk [vmem:[%s112_s3] sm:$0xff] %vm17_vm0, %v57_v2 }
   0x2   :  { %25 = vperm.xlu0 %55, %v22_v1   ;;  %v20_v3 = vld [vmem:[%s111_s0] sm:$0xff] }
   0x8   :  { %v30_v12 = vld [vmem:[%s110_s2] sm:$0xff] }
   0x9   :  { %v37_v14 = vld [vmem:[%s112_s3] sm:$0xff] }
  0x7d   :  { %v26_v5 = vpop.permute.xlu0 %25 }
  0x7e   :  { %v28_v6 = vsub.f32 %v20_v3, %v26_v5  ;;  %v29_v7 = vsub.f32 %v21_v4, %v26_v5 }
  0x80   :  { %v31_v8 = vadd.f32 %v29_v7, %v28_v6  ;;  %v38_v9 = vmul.f32 %v28_v6, %v28_v6  ;;  %v39_v10 = vmul.f32 %v29_v7, %v29_v7 }
  0x82   :  { %32 = vadd.xlane.f32.xlu0 %v31_v8  ;;  %v40_v11 = vadd.f32 %v39_v10, %v38_v9 }
  0x84   :  { %41 = vadd.xlane.f32.xlu1 %v40_v11 }
 0x10b   :  { %v33_v13 = vpop.xlane.xlu0 %32 }
 0x10c   :  { %v34_v15 = vadd.f32 %v33_v13, %v30_v12 }
 0x10d   :  { %v42_v16 = vpop.xlane.xlu1 %41 }
 0x10e   :  { %36 = vst.msk [vmem:[%s110_s2] sm:$0xff] %vm17_vm0, %v34_v15  ;;  %v43_v17 = vadd.f32 %v42_v16, %v37_v14 }
 0x110   :  { %44 = vst.msk [vmem:[%s112_s3] sm:$0xff] %vm17_vm0, %v43_v17 }

// kernel: momentum_bn_forward.3
= control target key start
LH: loop header
LB: loop body
LE: loop exit
PB: predicated region body
PF: predicated region fallthrough
CT: control target
= control target key end

     0   :  { %v40_v0 = vmov 0   ;;  %s79_s1 = inlined_call_operand.vmem [shape: f32[8,1], index: 1, kind: input, shape index: {}]   ;;  %s80_s2 = inlined_call_operand.vmem [shape: f32[8,1], index: 2, kind: input, shape index: {}]   ;;  %s81_s0 = inlined_call_operand.vmem [shape: f32[8,256], index: 0, kind: input, shape index: {}]   ;;  %s82_s3 = inlined_call_operand.vmem [shape: f32[8,256], index: 3, kind: output, shape index: {}]  }
   0x1   :  { %39 = vset.pattern.permute.xlu0 %v40_v0  ;;  %v16_v1 = vld [vmem:[%s79_s1] sm:$0xff]  ;;  %v15_v5 = vld [vmem:[%s81_s0 + $0x8] sm:$0xff] }
   0x2   :  { %19 = vperm.xlu0 %39, %v16_v1   ;;  %v24_v2 = vld [vmem:[%s80_s2] sm:$0xff] }
   0x3   :  { %v14_v4 = vld [vmem:[%s81_s0] sm:$0xff] }
   0x6   :  { %27 = vperm.xlu0 %39, %v24_v2  }
  0x7d   :  { %v20_v3 = vpop.permute.xlu0 %19 }
  0x7e   :  { %v22_v6 = vmul.f32 %v20_v3, %v14_v4  ;;  %v23_v7 = vmul.f32 %v20_v3, %v15_v5 }
  0x81   :  { %v28_v8 = vpop.permute.xlu0 %27 }
  0x82   :  { %v30_v9 = vadd.f32 %v28_v8, %v22_v6  ;;  %v31_v10 = vadd.f32 %v28_v8, %v23_v7 }
  0x84   :  { %32 = vst [vmem:[%s82_s3] sm:$0xff] %v30_v9  ;;  %33 = vst [vmem:[%s82_s3 + $0x8] sm:$0xff] %v31_v10 }

</bundles_post_ra>
